<compile_context>
chip_gen: v6e
topology: v6e:2x2x1
jax: 0.10.0
libtpu: 0.0.40
codegen_flags: <defaults>
</compile_context>

<pallas_src>
import jax
import jax.numpy as jnp
from jax.experimental import pallas as pl
from jax.experimental.pallas import tpu as pltpu


def _round_up(v, m):
    return (v + m - 1) // m * m


def _vmem_ceiling_bytes():
    """Per-generation scoped-VMEM ceiling with headroom for compiler scratch."""
    cap = None
    try:
        info = pltpu.get_tpu_info()
        for name in ("vmem_capacity_bytes", "vmem_size_bytes", "vmem_bytes"):
            cap = getattr(info, name, None)
            if cap:
                break
    except Exception:
        cap = None
    if not cap:
        cap = 64 * 1024 * 1024  # conservative fallback (v7x physical VMEM/TC)
    # ~25% headroom: v5e/v6e (128 MiB) -> ~96 MiB scoped, v7x (64 MiB) -> ~48 MiB.
    return int(cap) * 3 // 4


def _graphconv_kernel(adj_ref, h_ref, in_norm_ref, w_ref, bias_ref,
                      o_ref, acc_ref):
    k = pl.program_id(1)

    @pl.when(k == 0)
    def _():
        acc_ref[...] = jnp.zeros_like(acc_ref)

    # Partial neighbor-sum aggregation for this contraction chunk:
    # bf16 x bf16 MXU matmul (0/1 adjacency values are exact in bf16) with
    # f32 accumulation in a persistent VMEM scratch.
    acc_ref[...] += jnp.dot(adj_ref[...], h_ref[...],
                            preferred_element_type=jnp.float32)

    # Epilogue once the contraction over all source nodes is complete:
    # bf16 MXU matmul with the (pre-cast) weight, 'both' post-norm, bias.
    @pl.when(k == pl.num_programs(1) - 1)
    def _():
        y = jnp.dot(acc_ref[...].astype(jnp.bfloat16), w_ref[...],
                    preferred_element_type=jnp.float32)       # (tile_n, Fout)
        y = y * in_norm_ref[...] + bias_ref[...]
        # activation=None in the module default -> identity.
        o_ref[...] = y.astype(o_ref.dtype)


def prepare_graph(edges, *, tile_n=512, tile_k=1024):
    """Graph-static preprocessing, executed ONCE per graph (not per forward).

    edges: (N, N) boolean, edges[v, u] = True iff edge u -> v.
    Returns a dict carrying the padded bf16 adjacency, the rsqrt degree-norm
    vectors and the tile sizes used by dist_graph_conv.
    """
    N = edges.shape[0]
    n128 = _round_up(N, 128)

    tile_n = min(tile_n, n128)
    tile_k = min(tile_k, n128)
    # v7x has 2 TensorCores: keep the "parallel" row axis at >= 2 tiles when
    # the graph is large enough so both cores get work.
    if n128 >= 512 and n128 // tile_n < 2:
        tile_n = _round_up(n128 // 2, 128)

    # Rows and columns padded INDEPENDENTLY to their own tile sizes.
    n_rows = _round_up(N, tile_n)
    n_cols = _round_up(N, tile_k)

    # 0/1 adjacency stored graph-statically in bf16 (exact) and zero-padded
    # once; padded rows/cols are all-zero so they contribute nothing.
    adj = jnp.pad(edges.astype(jnp.bfloat16),
                  ((0, n_rows - N), (0, n_cols - N)))

    # Degree vectors from the exact boolean mask, converted to rsqrt norms
    # once (clamp(min=1) as in the module).
    out_deg = jnp.sum(edges, axis=0).astype(jnp.float32)       # source out-deg
    in_deg = jnp.sum(edges, axis=1).astype(jnp.float32)        # dest in-deg
    out_norm = jax.lax.rsqrt(jnp.maximum(out_deg, 1.0)).reshape(N, 1)
    in_norm = jax.lax.rsqrt(jnp.maximum(in_deg, 1.0)).reshape(N, 1)
    in_norm = jnp.pad(in_norm, ((0, n_rows - N), (0, 0)))      # padded rows ok
    # TODO(synk): on v5e/v6e an int8 adjacency (+ per-tile i8 h quantization)
    # would halve the dominant HBM stream; v7x MXU has no int support.

    return {
        "num_nodes": N,
        "adj": adj,
        "out_norm": out_norm,
        "in_norm": in_norm,
        "tile_n": tile_n,
        "tile_k": tile_k,
        "n_rows": n_rows,
        "n_cols": n_cols,
    }


def dist_graph_conv(graph, x, weight, bias):
    """Fused GraphConv forward (norm='both', weight+bias, no activation).

    graph:  dict from prepare_graph()
    x:      (N, Fin) float32 node features
    weight: (Fin, Fout) float32
    bias:   (Fout,) float32
    returns (N, Fout) float32, new_part_size (=[Fout], single partition)
    """
    N = graph["num_nodes"]
    tile_n, tile_k = graph["tile_n"], graph["tile_k"]
    n_rows, n_cols = graph["n_rows"], graph["n_cols"]
    Fin = x.shape[1]
    Fout = weight.shape[1]

    # Pad feature dims to full 128-lane vregs.
    fin_p = _round_up(Fin, 128)
    fout_p = _round_up(Fout, 128)

    # 'both' pre-norm + bf16 cast done once here (O(N*Fin)), so the kernel
    # streams an already-normalized bf16 h and does no per-tile norm work.
    h = (x * graph["out_norm"]).astype(jnp.bfloat16)
    h = jnp.pad(h, ((0, n_cols - N), (0, fin_p - Fin)))

    w = jnp.pad(weight, ((0, fin_p - Fin), (0, fout_p - Fout))).astype(jnp.bfloat16)
    b = jnp.pad(bias.reshape(1, Fout), ((0, 0), (0, fout_p - Fout)))

    grid = (n_rows // tile_n, n_cols // tile_k)

    # Scoped-VMEM budget: double-buffered streamed operands + small invariants
    # + f32 accumulator, x2 headroom, capped per chip generation.
    vmem_needed = (2 * tile_n * tile_k * 2           # adj tiles (bf16)
                   + 2 * tile_k * fin_p * 2          # h tiles (bf16)
                   + 2 * tile_n * fout_p * 4         # output tiles (f32)
                   + 2 * tile_n * 128 * 4            # in_norm tiles (lane pad)
                   + 2 * (fin_p * fout_p * 2 + fout_p * 4)   # weight + bias
                   + tile_n * fin_p * 4)             # accumulator scratch
    vmem_limit = int(min(max(2 * vmem_needed, 32 * 1024 * 1024),
                         _vmem_ceiling_bytes()))

    cost = pl.CostEstimate(
        flops=2 * n_rows * n_cols * fin_p + 2 * n_rows * fin_p * fout_p,
        transcendentals=0,
        bytes_accessed=(n_rows * n_cols * 2                       # bf16 adjacency
                        + grid[0] * n_cols * fin_p * 2            # h re-stream
                        + fin_p * fout_p * 2 + fout_p * 4         # weight/bias
                        + n_rows * fout_p * 4                     # output
                        + n_rows * 4),                            # in_norm
    )

    out = pl.pallas_call(
        _graphconv_kernel,
        out_shape=jax.ShapeDtypeStruct((n_rows, fout_p), x.dtype),
        grid_spec=pltpu.PrefetchScalarGridSpec(
            num_scalar_prefetch=0,
            grid=grid,
            in_specs=[
                # streamed adjacency tile: the dominant N^2 HBM stream
                pl.BlockSpec((tile_n, tile_k), lambda i, k: (i, k)),
                # pre-normalized bf16 source features: vary with k only
                pl.BlockSpec((tile_k, fin_p), lambda i, k: (k, 0)),
                # destination-node rsqrt(in_deg): vary with i only
                pl.BlockSpec((tile_n, 1), lambda i, k: (i, 0)),
                # grid-invariant weight / bias (tiny; default buffering)
                pl.BlockSpec((fin_p, fout_p), lambda i, k: (0, 0)),
                pl.BlockSpec((1, fout_p), lambda i, k: (0, 0)),
            ],
            out_specs=pl.BlockSpec((tile_n, fout_p), lambda i, k: (i, 0)),
            scratch_shapes=[pltpu.VMEM((tile_n, fin_p), jnp.float32)],
        ),
        compiler_params=pltpu.CompilerParams(
            dimension_semantics=("parallel", "arbitrary"),
            vmem_limit_bytes=vmem_limit),
        cost_estimate=cost,
    )(graph["adj"], h, graph["in_norm"], w, b)

    # TODO(synk): dist_mm partition bookkeeping / process-group collectives,
    # dataloader halo exchange (comm.sync + indexed_add) and rank-based bias
    # slicing have no single-device Pallas equivalent; new_part_size is
    # trivially the full output width here.
    new_part_size = jnp.array([Fout], dtype=jnp.int32)
    return out[:N, :Fout], new_part_size


def _reference(adj_f32, x, weight, bias):
    out_deg = jnp.clip(jnp.sum(adj_f32, axis=0), 1.0, None)
    in_deg = jnp.clip(jnp.sum(adj_f32, axis=1), 1.0, None)
    h = x * (out_deg ** -0.5)[:, None]
    agg = adj_f32 @ h
    y = agg @ weight
    y = y * (in_deg ** -0.5)[:, None]
    return y + bias[None, :]


if __name__ == "__main__":
    N, Fin, Fout = 256, 64, 128

    key = jax.random.PRNGKey(0)
    k_adj, k_x, k_w = jax.random.split(key, 3)

    # Random sparse-ish directed graph. All graph-static work (bf16 adjacency,
    # padding, degree norms, tile selection) is done ONCE in prepare_graph.
    edges = jax.random.uniform(k_adj, (N, N)) < 0.1    # edges[v, u]: u -> v
    graph = prepare_graph(edges)

    x = jax.random.normal(k_x, (N, Fin), dtype=jnp.float32)

    # Xavier-uniform init for weight (as in reset_parameters); bias zeros.
    bound = (6.0 / (Fin + Fout)) ** 0.5
    weight = jax.random.uniform(k_w, (Fin, Fout), minval=-bound, maxval=bound,
                                dtype=jnp.float32)
    bias = jnp.zeros((Fout,), dtype=jnp.float32)

    out, part_size = dist_graph_conv(graph, x, weight, bias)
    out = jax.block_until_ready(out)

    ref = _reference(edges.astype(jnp.float32), x, weight, bias)
    assert out.shape == (N, Fout)
    # bf16 feature / epilogue streams give ~1e-2 relative error vs the f32
    # reference; exact for the 0/1 adjacency values themselves.
    assert jnp.allclose(out, ref, atol=2e-2, rtol=2e-2), \
        float(jnp.max(jnp.abs(out - ref)))

    print("KERNEL_OK")
</pallas_src>

<mosaic_0001>
module attributes {stable_mosaic.version = 11 : i64} {
  func.func @_graphconv_kernel(%arg0: i32, %arg1: i32, %arg2: memref<256x256xbf16, #tpu.memory_space<vmem>>, %arg3: memref<256x128xbf16, #tpu.memory_space<vmem>>, %arg4: memref<256x1xf32, #tpu.memory_space<vmem>>, %arg5: memref<128x128xbf16, #tpu.memory_space<vmem>>, %arg6: memref<1x128xf32, #tpu.memory_space<vmem>>, %arg7: memref<256x128xf32, #tpu.memory_space<vmem>>, %arg8: memref<256x128xf32, #tpu.memory_space<vmem>>) attributes {dimension_semantics = [#tpu.dimension_semantics<parallel>, #tpu.dimension_semantics<arbitrary>], iteration_bounds = array<i64: 1, 1>, scalar_prefetch = 0 : i64, scratch_operands = 1 : i64, tpu.core_type = #tpu.core_type<tc>, window_params = [{transform_indices = @transform_0, window_bounds = array<i64: 256, 256>}, {transform_indices = @transform_1, window_bounds = array<i64: 256, 128>}, {transform_indices = @transform_2, window_bounds = array<i64: 256, 1>}, {pipeline_mode = #tpu.pipeline_mode<synchronous>, transform_indices = @transform_3, window_bounds = array<i64: 128, 128>}, {pipeline_mode = #tpu.pipeline_mode<synchronous>, transform_indices = @transform_4, window_bounds = array<i64: 1, 128>}, {transform_indices = @transform_5, window_bounds = array<i64: 256, 128>}]} {
    %c0_i32 = arith.constant 0 : i32
    %0 = arith.cmpi eq, %arg1, %c0_i32 : i32
    %1 = arith.extui %0 : i1 to i32
    %c0_i32_0 = arith.constant 0 : i32
    %2 = arith.cmpi ne, %1, %c0_i32_0 : i32
    scf.if %2 {
      %cst_10 = arith.constant 0.000000e+00 : f32
      %12 = vector.broadcast %cst_10 : f32 to vector<256x128xf32>
      %c0_11 = arith.constant 0 : index
      %c0_12 = arith.constant 0 : index
      %13 = vector.load %arg8[%c0_11, %c0_12] : memref<256x128xf32, #tpu.memory_space<vmem>>, vector<256x128xf32>
      tpu.vector_store %arg8[%c0_11, %c0_12], %12 {strides = array<i32>} : memref<256x128xf32, #tpu.memory_space<vmem>>, vector<256x128xf32>,
    } else {
    }
    %c0 = arith.constant 0 : index
    %c0_1 = arith.constant 0 : index
    %3 = vector.load %arg8[%c0, %c0_1] : memref<256x128xf32, #tpu.memory_space<vmem>>, vector<256x128xf32>
    %c0_2 = arith.constant 0 : index
    %c0_3 = arith.constant 0 : index
    %4 = vector.load %arg2[%c0_2, %c0_3] : memref<256x256xbf16, #tpu.memory_space<vmem>>, vector<256x256xbf16>
    %c0_4 = arith.constant 0 : index
    %c0_5 = arith.constant 0 : index
    %5 = vector.load %arg3[%c0_4, %c0_5] : memref<256x128xbf16, #tpu.memory_space<vmem>>, vector<256x128xbf16>
    %cst = arith.constant dense<0.000000e+00> : vector<256x128xf32>
    %6 = tpu.matmul %4, %5, %cst {dimension_numbers = #tpu.dot_dimension_numbers<[1], [0], [0], [1], [0, 0, 1, 1], [], []>} : vector<256x256xbf16>, vector<256x128xbf16>, vector<256x128xf32> -> vector<256x128xf32>
    %7 = arith.addf %3, %6 : vector<256x128xf32>
    %c0_6 = arith.constant 0 : index
    %c0_7 = arith.constant 0 : index
    %8 = vector.load %arg8[%c0_6, %c0_7] : memref<256x128xf32, #tpu.memory_space<vmem>>, vector<256x128xf32>
    tpu.vector_store %arg8[%c0_6, %c0_7], %7 {strides = array<i32>} : memref<256x128xf32, #tpu.memory_space<vmem>>, vector<256x128xf32>,
    %c0_i32_8 = arith.constant 0 : i32
    %9 = arith.cmpi eq, %arg1, %c0_i32_8 : i32
    %10 = arith.extui %9 : i1 to i32
    %c0_i32_9 = arith.constant 0 : i32
    %11 = arith.cmpi ne, %10, %c0_i32_9 : i32
    scf.if %11 {
      %c0_10 = arith.constant 0 : index
      %c0_11 = arith.constant 0 : index
      %12 = vector.load %arg8[%c0_10, %c0_11] : memref<256x128xf32, #tpu.memory_space<vmem>>, vector<256x128xf32>
      %13 = arith.truncf %12 : vector<256x128xf32> to vector<256x128xbf16>
      %c0_12 = arith.constant 0 : index
      %c0_13 = arith.constant 0 : index
      %14 = vector.load %arg5[%c0_12, %c0_13] : memref<128x128xbf16, #tpu.memory_space<vmem>>, vector<128x128xbf16>
      %cst_14 = arith.constant dense<0.000000e+00> : vector<256x128xf32>
      %15 = tpu.matmul %13, %14, %cst_14 {dimension_numbers = #tpu.dot_dimension_numbers<[1], [0], [0], [1], [0, 0, 1, 1], [], []>} : vector<256x128xbf16>, vector<128x128xbf16>, vector<256x128xf32> -> vector<256x128xf32>
      %c0_15 = arith.constant 0 : index
      %c0_16 = arith.constant 0 : index
      %16 = vector.load %arg4[%c0_15, %c0_16] : memref<256x1xf32, #tpu.memory_space<vmem>>, vector<256x1xf32>
      %17 = vector.broadcast %16 : vector<256x1xf32> to vector<256x128xf32>
      %18 = arith.mulf %15, %17 : vector<256x128xf32>
      %c0_17 = arith.constant 0 : index
      %c0_18 = arith.constant 0 : index
      %19 = vector.load %arg6[%c0_17, %c0_18] : memref<1x128xf32, #tpu.memory_space<vmem>>, vector<1x128xf32>
      %20 = vector.broadcast %19 : vector<1x128xf32> to vector<256x128xf32>
      %21 = arith.addf %18, %20 : vector<256x128xf32>
      %c0_19 = arith.constant 0 : index
      %c0_20 = arith.constant 0 : index
      %22 = vector.load %arg7[%c0_19, %c0_20] : memref<256x128xf32, #tpu.memory_space<vmem>>, vector<256x128xf32>
      tpu.vector_store %arg7[%c0_19, %c0_20], %21 {strides = array<i32>} : memref<256x128xf32, #tpu.memory_space<vmem>>, vector<256x128xf32>,
    } else {
    }
    return
  }
  func.func @transform_0(%arg0: i32, %arg1: i32) -> (i32, i32) {
    %c0_i32 = arith.constant 0 : i32
    return %arg0, %arg1 : i32, i32
  }
  func.func @transform_1(%arg0: i32, %arg1: i32) -> (i32, i32) {
    %c0_i32 = arith.constant 0 : i32
    %c0_i32_0 = arith.constant 0 : i32
    return %arg1, %c0_i32 : i32, i32
  }
  func.func @transform_2(%arg0: i32, %arg1: i32) -> (i32, i32) {
    %c0_i32 = arith.constant 0 : i32
    %c0_i32_0 = arith.constant 0 : i32
    return %arg0, %c0_i32 : i32, i32
  }
  func.func @transform_3(%arg0: i32, %arg1: i32) -> (i32, i32) {
    %c0_i32 = arith.constant 0 : i32
    %c0_i32_0 = arith.constant 0 : i32
    %c0_i32_1 = arith.constant 0 : i32
    return %c0_i32, %c0_i32_0 : i32, i32
  }
  func.func @transform_4(%arg0: i32, %arg1: i32) -> (i32, i32) {
    %c0_i32 = arith.constant 0 : i32
    %c0_i32_0 = arith.constant 0 : i32
    %c0_i32_1 = arith.constant 0 : i32
    return %c0_i32, %c0_i32_0 : i32, i32
  }
  func.func @transform_5(%arg0: i32, %arg1: i32) -> (i32, i32) {
    %c0_i32 = arith.constant 0 : i32
    %c0_i32_0 = arith.constant 0 : i32
    return %arg0, %c0_i32 : i32, i32
  }
}

</mosaic_0001>

<bundles_post_ra>
// kernel: tpu_custom_call.1
= control target key start
LH: loop header
LB: loop body
LE: loop exit
PB: predicated region body
PF: predicated region fallthrough
CT: control target
= control target key end

     0   :  { %10 = vsyncpa [#allocation4], 0  ;;  %s1933_s0 = inlined_call_operand.vmem [shape: bf16[256,256], index: 0, kind: input, shape index: {}]   ;;  %s1934_s1 = inlined_call_operand.hbm [shape: bf16[256,128], index: 1, kind: input, shape index: {}]   ;;  %s1935_s2 = inlined_call_operand.vmem [shape: f32[256,1], index: 2, kind: input, shape index: {}]   ;;  %s1936_s3 = inlined_call_operand.hbm [shape: bf16[128,128], index: 3, kind: input, shape index: {}]   ;;  %s1937_s4 = inlined_call_operand.vmem [shape: f32[1,128], index: 4, kind: input, shape index: {}]   ;;  %s1938_s5 = inlined_call_operand.hbm [shape: f32[256,128], index: 5, kind: output, shape index: {}]  }
   0x1   :  { %11 = vsyncpa [#allocation7], 0 }
   0x2   :  { %12 = vsyncpa [#allocation5], 0  ;;  %s1657_s18 = smov [#allocation3]  }
   0x3   :  { %s20_s19 = sshll.u32 %s1657_s18, 4  ;;  %s21_s19 = int_to_ptr.vmem [resolvable:$true] %s20_s19 }
   0x4   :  { %s1599_s20 = scalar_lea.vmem %s21_s19, 2048  ;;  %p1604_p1 = scmp.lt.s32.totalorder %s21_s19, %s21_s19 }
   0x5   :  { %p1600_p0 = scmp.ne.s32.totalorder %s21_s19, %s1599_s20  ;;  %p1605_p2 = scmp.lt.s32.totalorder %s1599_s20, %s1599_s20 }
   0x7   :  { %p1606_p3 = por %p1605_p2, %p1604_p1 }
   0x9   :  { %p1607_p4 = pnand %p1606_p3, %p1600_p0 }
   0xb   :  { %1610 = shalt.err (!%p1607_p4)
}
   0xc   :  { %s1658_s21 = smov 64   ;;  %s1659_s22 = smov 4  }
   0xd   :  { %26 = dma.hbm_to_vmem [thread:$0]  %s1934_s1, 2048, %s21_s19, [#allocation4], %s1658_s21, %s1658_s21, %s1659_s22  }
   0xe   :  { %s1660_s25 = smov [#allocation6]  }
   0xf   :  { %s34_s26 = sshll.u32 %s1660_s25, 4  ;;  %s35_s26 = int_to_ptr.vmem [resolvable:$true] %s34_s26 }
  0x10   :  { %s1619_s27 = scalar_lea.vmem %s35_s26, 1024  ;;  %p1624_p6 = scmp.lt.s32.totalorder %s35_s26, %s35_s26 }
  0x11   :  { %p1620_p5 = scmp.ne.s32.totalorder %s35_s26, %s1619_s27  ;;  %p1625_p7 = scmp.lt.s32.totalorder %s1619_s27, %s1619_s27 }
  0x13   :  { %p1626_p8 = por %p1625_p7, %p1624_p6 }
  0x15   :  { %p1627_p9 = pnand %p1626_p8, %p1620_p5 }
  0x17   :  { %1630 = shalt.err (!%p1627_p9)
}
  0x18   :  { %40 = dma.hbm_to_vmem [thread:$0]  %s1936_s3, 1024, %s35_s26, [#allocation7], %s1658_s21, %s1658_s21, %s1659_s22  }
  0x19   :  { %1651 = dma.done.wait [#allocation4], 2048  }
  0x1a   :  { %1652 = vsyncadd [#allocation4], 4294965248 }
  0x1b   :  { %1653 = dma.done.wait [#allocation7], 1024  }
  0x1c   :  { %1654 = vsyncadd [#allocation7], 4294966272  ;;  %v1519_v0 = vld [vmem:[#allocation3 + $0x78] sm:$0xff]   ;;  %v1521_v2 = vld [vmem:[#allocation3 + $0x70] sm:$0xff]   ;;  %v1661_v58 = vmov 0  }
  0x1d   :  { %v1520_v1 = vld [vmem:[#allocation3 + $0x38] sm:$0xff]   ;;  %1309 = vmatprep.subr.bf16.mxu0 %v1519_v0  ;;  %1493 = vmatprep.subr.bf16.mxu1 %v1519_v0  ;;  %v1522_v3 = vld [vmem:[#allocation3 + $0x30] sm:$0xff]   ;;  %v1523_v4 = vld [vmem:[#allocation3 + $0x68] sm:$0xff]  }
  0x1e   :  { %1310 = vmatpush3.bf16.msra.mxu0 %v1520_v1  ;;  %1501 = vmatpush3.bf16.msra.mxu1 %v1520_v1  ;;  %v1524_v5 = vld [vmem:[#allocation3 + $0x28] sm:$0xff]   ;;  %v1525_v6 = vld [vmem:[#allocation3 + $0x60] sm:$0xff]   ;;  %v1527_v8 = vld [vmem:[#allocation3 + $0x58] sm:$0xff]  }
  0x1f   :  { %1311 = vmatprep.subr.bf16.mxu0 %v1521_v2  ;;  %1494 = vmatprep.subr.bf16.mxu1 %v1521_v2  ;;  %v1526_v7 = vld [vmem:[#allocation3 + $0x20] sm:$0xff]   ;;  %v1528_v9 = vld [vmem:[#allocation3 + $0x18] sm:$0xff]   ;;  %v1529_v10 = vld [vmem:[#allocation3 + $0x50] sm:$0xff]  }
  0x20   :  { %v1537_v11 = vld [vmem:[%s1933_s0 + $0x4] ss:$8 sps:$4 sm:$0xff]   ;;  %v1530_v12 = vld [vmem:[#allocation3 + $0x10] sm:$0xff]   ;;  %v1535_v17 = vld [vmem:[%s1933_s0] ss:$8 sps:$4 sm:$0xff]   ;;  %1518 = vset.pattern.permute.xlu1 %v1661_v58  ;;  %1517 = vset.pattern.permute.xlu0 %v1661_v58 }
  0x21   :  { %470 = vmatprep.mubr.bf16.mxu0 %v1537_v11  ;;  %v1531_v13 = vld [vmem:[#allocation3 + $0x48] sm:$0xff]   ;;  %v1533_v15 = vld [vmem:[#allocation3 + $0x40] sm:$0xff]   ;;  %v1538_v19 = vld [vmem:[%s1933_s0 + $0x14] ss:$8 sps:$4 sm:$0xff]  }
  0x22   :  { %1312 = vmatpush3.bf16.msra.mxu0 %v1522_v3  ;;  %1502 = vmatpush3.bf16.msra.mxu1 %v1522_v3  ;;  %v1532_v14 = vld [vmem:[#allocation3 + $0x8] sm:$0xff]   ;;  %v1534_v16 = vld [vmem:[#allocation3] sm:$0xff]   ;;  %v1571_v21 = vld [vmem:[%s1933_s0 + $0xd4] ss:$8 sps:$4 sm:$0xff]  }
  0x23   :  { %1313 = vmatprep.subr.bf16.mxu0 %v1523_v4  ;;  %1495 = vmatprep.subr.bf16.mxu1 %v1523_v4  ;;  %v1567_v18 = vld [vmem:[%s1933_s0 + $0xc4] ss:$8 sps:$4 sm:$0xff]   ;;  %v1565_v20 = vld [vmem:[%s1933_s0 + $0xc0] ss:$8 sps:$4 sm:$0xff]   ;;  %v1540_v22 = vld [vmem:[%s1933_s0 + $0x10] ss:$8 sps:$4 sm:$0xff]  }
  0x24   :  { %566 = vmatprep.mubr.bf16.mxu1 %v1567_v18  ;;  %v1541_v23 = vld [vmem:[%s1933_s0 + $0x24] ss:$8 sps:$4 sm:$0xff]   ;;  %v1573_v24 = vld [vmem:[%s1933_s0 + $0xd0] ss:$8 sps:$4 sm:$0xff]   ;;  %v1543_v29 = vld [vmem:[%s1933_s0 + $0x20] ss:$8 sps:$4 sm:$0xff]  }
  0x25   :  { %v1583_v25 = vld [vmem:[#allocation6 + $0x38] sm:$0xff]   ;;  %v1584_v26 = vld [vmem:[#allocation6 + $0x30] sm:$0xff]   ;;  %v1577_v27 = vld [vmem:[%s1933_s0 + $0xe4] ss:$8 sps:$4 sm:$0xff]  }
  0x26   :  { %1314 = vmatpush3.bf16.msra.mxu0 %v1524_v5  ;;  %1503 = vmatpush3.bf16.msra.mxu1 %v1524_v5  ;;  %v1585_v28 = vld [vmem:[#allocation6 + $0x28] sm:$0xff]   ;;  %v1586_v30 = vld [vmem:[#allocation6 + $0x20] sm:$0xff]   ;;  %v1544_v31 = vld [vmem:[%s1933_s0 + $0x34] ss:$8 sps:$4 sm:$0xff]  }
  0x27   :  { %1315 = vmatprep.subr.bf16.mxu0 %v1525_v6  ;;  %1496 = vmatprep.subr.bf16.mxu1 %v1525_v6  ;;  %v1579_v32 = vld [vmem:[%s1933_s0 + $0xe0] ss:$8 sps:$4 sm:$0xff]   ;;  %v1580_v33 = vld [vmem:[%s1933_s0 + $0xf4] ss:$8 sps:$4 sm:$0xff]   ;;  %v1546_v34 = vld [vmem:[%s1933_s0 + $0x30] ss:$8 sps:$4 sm:$0xff]  }
  0x28   :  { %v1547_v35 = vld [vmem:[%s1933_s0 + $0x44] ss:$8 sps:$4 sm:$0xff]   ;;  %v1582_v36 = vld [vmem:[%s1933_s0 + $0xf0] ss:$8 sps:$4 sm:$0xff]   ;;  %v1549_v37 = vld [vmem:[%s1933_s0 + $0x40] ss:$8 sps:$4 sm:$0xff]  }
  0x29   :  { %v1550_v38 = vld [vmem:[%s1933_s0 + $0x54] ss:$8 sps:$4 sm:$0xff]   ;;  %v1552_v39 = vld [vmem:[%s1933_s0 + $0x50] ss:$8 sps:$4 sm:$0xff]   ;;  %v1553_v40 = vld [vmem:[%s1933_s0 + $0x64] ss:$8 sps:$4 sm:$0xff]  }
  0x2a   :  { %1316 = vmatpush3.bf16.msra.mxu0 %v1526_v7  ;;  %1504 = vmatpush3.bf16.msra.mxu1 %v1526_v7  ;;  %v1555_v41 = vld [vmem:[%s1933_s0 + $0x60] ss:$8 sps:$4 sm:$0xff]   ;;  %v1556_v42 = vld [vmem:[%s1933_s0 + $0x74] ss:$8 sps:$4 sm:$0xff]   ;;  %v1558_v43 = vld [vmem:[%s1933_s0 + $0x70] ss:$8 sps:$4 sm:$0xff]  }
  0x2b   :  { %1317 = vmatprep.subr.bf16.mxu0 %v1527_v8  ;;  %1497 = vmatprep.subr.bf16.mxu1 %v1527_v8  ;;  %v1559_v44 = vld [vmem:[%s1933_s0 + $0x84] ss:$8 sps:$4 sm:$0xff]   ;;  %v1561_v45 = vld [vmem:[%s1933_s0 + $0x80] ss:$8 sps:$4 sm:$0xff]   ;;  %v1562_v46 = vld [vmem:[%s1933_s0 + $0x94] ss:$8 sps:$4 sm:$0xff]  }
  0x2c   :  { %v1587_v47 = vld [vmem:[#allocation6 + $0x18] sm:$0xff]   ;;  %v1568_v49 = vld [vmem:[%s1933_s0 + $0xa4] ss:$8 sps:$4 sm:$0xff]   ;;  %v1588_v50 = vld [vmem:[#allocation6 + $0x10] sm:$0xff]  }
  0x2d   :  { %v1564_v48 = vld [vmem:[%s1933_s0 + $0x90] ss:$8 sps:$4 sm:$0xff]   ;;  %v1589_v51 = vld [vmem:[#allocation6 + $0x8] sm:$0xff]   ;;  %v1574_v53 = vld [vmem:[%s1933_s0 + $0xb4] ss:$8 sps:$4 sm:$0xff]  }
  0x2e   :  { %1318 = vmatpush3.bf16.msra.mxu0 %v1528_v9  ;;  %1505 = vmatpush3.bf16.msra.mxu1 %v1528_v9  ;;  %v1570_v52 = vld [vmem:[%s1933_s0 + $0xa0] ss:$8 sps:$4 sm:$0xff]   ;;  %v1576_v55 = vld [vmem:[%s1933_s0 + $0xb0] ss:$8 sps:$4 sm:$0xff]  }
  0x2f   :  { %1319 = vmatprep.subr.bf16.mxu0 %v1529_v10  ;;  %1498 = vmatprep.subr.bf16.mxu1 %v1529_v10  ;;  %v1590_v54 = vld [vmem:[#allocation6] sm:$0xff]   ;;  %v941_v56 = vld [vmem:[%s1935_s2 + $0x10] sm:$0xff]  ;;  %v942_v59 = vld [vmem:[%s1935_s2 + $0x18] sm:$0xff] }
  0x30   :  { %v939_v57 = vld [vmem:[%s1935_s2] sm:$0xff]  ;;  %983 = vperm.xlu1 %1518, %v941_v56   ;;  %v940_v60 = vld [vmem:[%s1935_s2 + $0x8] sm:$0xff]  ;;  %v946_v63 = vld [vmem:[%s1935_s2 + $0x38] sm:$0xff] }
  0x31   :  { %973 = vperm.xlu0 %1517, %v939_v57   ;;  %v944_v61 = vld [vmem:[%s1935_s2 + $0x28] sm:$0xff]  ;;  %v943_v62 = vld [vmem:[%s1935_s2 + $0x20] sm:$0xff]  ;;  %v945_v0 = vld [vmem:[%s1935_s2 + $0x30] sm:$0xff] }
  0x32   :  { %1320 = vmatpush3.bf16.msra.mxu0 %v1530_v12  ;;  %1506 = vmatpush3.bf16.msra.mxu1 %v1530_v12  ;;  %v948_v1 = vld [vmem:[%s1935_s2 + $0x48] sm:$0xff]  ;;  %v947_v2 = vld [vmem:[%s1935_s2 + $0x40] sm:$0xff]  ;;  %v950_v3 = vld [vmem:[%s1935_s2 + $0x58] sm:$0xff] }
  0x33   :  { %1321 = vmatprep.subr.bf16.mxu0 %v1531_v13  ;;  %1499 = vmatprep.subr.bf16.mxu1 %v1531_v13  ;;  %v949_v4 = vld [vmem:[%s1935_s2 + $0x50] sm:$0xff]  ;;  %v952_v5 = vld [vmem:[%s1935_s2 + $0x68] sm:$0xff]  ;;  %v951_v6 = vld [vmem:[%s1935_s2 + $0x60] sm:$0xff] }
  0x34   :  { %988 = vperm.xlu1 %1518, %v942_v59   ;;  %v954_v7 = vld [vmem:[%s1935_s2 + $0x78] sm:$0xff]  ;;  %v953_v8 = vld [vmem:[%s1935_s2 + $0x70] sm:$0xff]  ;;  %v956_v9 = vld [vmem:[%s1935_s2 + $0x88] sm:$0xff] }
  0x35   :  { %978 = vperm.xlu0 %1517, %v940_v60   ;;  %v955_v10 = vld [vmem:[%s1935_s2 + $0x80] sm:$0xff]  ;;  %v958_v11 = vld [vmem:[%s1935_s2 + $0x98] sm:$0xff]  ;;  %v957_v12 = vld [vmem:[%s1935_s2 + $0x90] sm:$0xff] }
  0x36   :  { %1322 = vmatpush3.bf16.msra.mxu0 %v1532_v14  ;;  %1507 = vmatpush3.bf16.msra.mxu1 %v1532_v14  ;;  %v960_v13 = vld [vmem:[%s1935_s2 + $0xa8] sm:$0xff]  ;;  %v959_v14 = vld [vmem:[%s1935_s2 + $0xa0] sm:$0xff] }
  0x37   :  { %1323 = vmatprep.subr.bf16.mxu0 %v1533_v15  ;;  %1500 = vmatprep.subr.bf16.mxu1 %v1533_v15  ;;  %v962_v15 = vld [vmem:[%s1935_s2 + $0xb8] sm:$0xff]  ;;  %v963_v18 = vld [vmem:[%s1935_s2 + $0xc0] sm:$0xff] }
  0x38   :  { %998 = vperm.xlu1 %1518, %v944_v61  }
  0x39   :  { %993 = vperm.xlu0 %1517, %v943_v62  }
  0x3a   :  { %1324 = vmatpush3.bf16.msra.mxu0 %v1534_v16  ;;  %1508 = vmatpush3.bf16.msra.mxu1 %v1534_v16  ;;  %v961_v16 = vld [vmem:[%s1935_s2 + $0xb0] sm:$0xff] }
  0x3b   :  { %1445 = vmatprep.subr.bf16.mxu1 %v1583_v25 }
  0x3c   :  { %1008 = vperm.xlu1 %1518, %v946_v63  }
  0x3d   :  { %471 = vmatmul.mubr.bf16.vlgmr.msra.gmra.mxu0 %v1535_v17  ;;  %567 = vmatmul.mubr.bf16.vlgmr.msra.gmra.mxu1 %v1565_v20  ;;  %v964_v17 = vld [vmem:[%s1935_s2 + $0xc8] sm:$0xff]  ;;  %v965_v20 = vld [vmem:[%s1935_s2 + $0xd0] sm:$0xff] }
  0x3e   :  { %478 = vmatprep.mubr.bf16.mxu0 %v1538_v19  ;;  %574 = vmatprep.mubr.bf16.mxu1 %v1571_v21  ;;  %v966_v19 = vld [vmem:[%s1935_s2 + $0xd8] sm:$0xff]  ;;  %v968_v21 = vld [vmem:[%s1935_s2 + $0xe8] sm:$0xff] }
  0x3f   :  { %1446 = vmatpush3.bf16.msra.mxu1 %v1583_v25  ;;  %1003 = vperm.xlu0 %1517, %v945_v0  }
  0x40   :  { %1447 = vmatprep.subr.bf16.mxu1 %v1584_v26  ;;  %1018 = vperm.xlu1 %1518, %v948_v1  }
  0x43   :  { %1448 = vmatpush3.bf16.msra.mxu1 %v1584_v26  ;;  %1013 = vperm.xlu0 %1517, %v947_v2  }
  0x44   :  { %1449 = vmatprep.subr.bf16.mxu1 %v1585_v28  ;;  %1028 = vperm.xlu1 %1518, %v950_v3  }
  0x45   :  { %479 = vmatmul.mubr.bf16.gmra.mxu0 %v1540_v22  ;;  %575 = vmatmul.mubr.bf16.gmra.mxu1 %v1573_v24  ;;  %v967_v22 = vld [vmem:[%s1935_s2 + $0xe0] sm:$0xff]  ;;  %v969_v24 = vld [vmem:[%s1935_s2 + $0xf0] sm:$0xff] }
  0x46   :  { %486 = vmatprep.mubr.bf16.mxu0 %v1541_v23  ;;  %582 = vmatprep.mubr.bf16.mxu1 %v1577_v27  ;;  %v970_v23 = vld [vmem:[%s1935_s2 + $0xf8] sm:$0xff] }
  0x47   :  { %1450 = vmatpush3.bf16.msra.mxu1 %v1585_v28  ;;  %1023 = vperm.xlu0 %1517, %v949_v4  }
  0x48   :  { %1451 = vmatprep.subr.bf16.mxu1 %v1586_v30  ;;  %1038 = vperm.xlu1 %1518, %v952_v5  }
  0x4b   :  { %1452 = vmatpush3.bf16.msra.mxu1 %v1586_v30  ;;  %1033 = vperm.xlu0 %1517, %v951_v6  }
  0x4c   :  { %1453 = vmatprep.subr.bf16.mxu1 %v1587_v47  ;;  %1048 = vperm.xlu1 %1518, %v954_v7  }
  0x4d   :  { %487 = vmatmul.mubr.bf16.gmra.mxu0 %v1543_v29  ;;  %583 = vmatmul.mubr.bf16.gmra.mxu1 %v1579_v32 }
  0x4e   :  { %494 = vmatprep.mubr.bf16.mxu0 %v1544_v31  ;;  %590 = vmatprep.mubr.bf16.mxu1 %v1580_v33 }
  0x4f   :  { %1454 = vmatpush3.bf16.msra.mxu1 %v1587_v47  ;;  %1043 = vperm.xlu0 %1517, %v953_v8  }
  0x50   :  { %1455 = vmatprep.subr.bf16.mxu1 %v1588_v50  ;;  %1058 = vperm.xlu1 %1518, %v956_v9  }
  0x53   :  { %1456 = vmatpush3.bf16.msra.mxu1 %v1588_v50  ;;  %1053 = vperm.xlu0 %1517, %v955_v10  }
  0x54   :  { %1457 = vmatprep.subr.bf16.mxu1 %v1589_v51  ;;  %1068 = vperm.xlu1 %1518, %v958_v11  }
  0x55   :  { %495 = vmatmul.mubr.bf16.gmra.mxu0 %v1546_v34  ;;  %591 = vmatmul.mubr.bf16.gmra.mxu1 %v1582_v36 }
  0x56   :  { %502 = vmatprep.mubr.bf16.mxu0 %v1547_v35 }
  0x57   :  { %1458 = vmatpush3.bf16.msra.mxu1 %v1589_v51  ;;  %1063 = vperm.xlu0 %1517, %v957_v12  }
  0x58   :  { %1459 = vmatprep.subr.bf16.mxu1 %v1590_v54  ;;  %1078 = vperm.xlu1 %1518, %v960_v13  }
  0x5b   :  { %1460 = vmatpush3.bf16.msra.mxu1 %v1590_v54  ;;  %1073 = vperm.xlu0 %1517, %v959_v14  }
  0x5c   :  { %1088 = vperm.xlu1 %1518, %v962_v15  }
  0x5d   :  { %503 = vmatmul.mubr.bf16.gmra.mxu0 %v1549_v37 }
  0x5e   :  { %510 = vmatprep.mubr.bf16.mxu0 %v1550_v38 }
  0x5f   :  { %1083 = vperm.xlu0 %1517, %v961_v16  }
  0x60   :  { %1098 = vperm.xlu1 %1518, %v964_v17  }
  0x63   :  { %1093 = vperm.xlu0 %1517, %v963_v18  }
  0x64   :  { %1108 = vperm.xlu1 %1518, %v966_v19  }
  0x65   :  { %511 = vmatmul.mubr.bf16.gmra.mxu0 %v1552_v39 }
  0x66   :  { %518 = vmatprep.mubr.bf16.mxu0 %v1553_v40 }
  0x67   :  { %1103 = vperm.xlu0 %1517, %v965_v20  }
  0x68   :  { %1118 = vperm.xlu1 %1518, %v968_v21  }
  0x6b   :  { %1113 = vperm.xlu0 %1517, %v967_v22  }
  0x6c   :  { %1128 = vperm.xlu1 %1518, %v970_v23  }
  0x6d   :  { %519 = vmatmul.mubr.bf16.gmra.mxu0 %v1555_v41 }
  0x6e   :  { %526 = vmatprep.mubr.bf16.mxu0 %v1556_v42 }
  0x6f   :  { %1123 = vperm.xlu0 %1517, %v969_v24  }
  0x75   :  { %527 = vmatmul.mubr.bf16.gmra.mxu0 %v1558_v43 }
  0x76   :  { %534 = vmatprep.mubr.bf16.mxu0 %v1559_v44 }
  0x7d   :  { %535 = vmatmul.mubr.bf16.gmra.mxu0 %v1561_v45 }
  0x7e   :  { %542 = vmatprep.mubr.bf16.mxu0 %v1562_v46 }
  0x85   :  { %543 = vmatmul.mubr.bf16.gmra.mxu0 %v1564_v48 }
  0x86   :  { %550 = vmatprep.mubr.bf16.mxu0 %v1568_v49 }
  0x8d   :  { %551 = vmatmul.mubr.bf16.gmra.mxu0 %v1570_v52 }
  0x8e   :  { %558 = vmatprep.mubr.bf16.mxu0 %v1574_v53 }
  0x95   :  { %559 = vmatmul.mubr.bf16.gmra.mxu0 %v1576_v55 }
  0xfd   :  { %v1325_v25 = vpop.f32.mrf.mxu0  ;;  %v1397_v0 = vpop.f32.mrf.mxu1 }
  0xff   :  { %v1326_v26 = vpop.f32.mrf.mxu0  ;;  %v1398_v6 = vpop.f32.mrf.mxu1 }
 0x100   :  { %v1327_v29 = vadd.f32 %v1326_v26, %v1325_v25 }
 0x101   :  { %v1328_v27 = vpop.f32.mrf.mxu0  ;;  %v1400_v9 = vpop.f32.mrf.mxu1 }
 0x103   :  { %v1329_v28 = vpop.f32.mrf.mxu0  ;;  %v1401_v15 = vpop.f32.mrf.mxu1 }
 0x104   :  { %v1330_v30 = vadd.f32 %v1329_v28, %v1328_v27 }
 0x105   :  { %v1331_v31 = vpop.f32.mrf.mxu0  ;;  %v1403_v18 = vpop.f32.mrf.mxu1 }
 0x106   :  { %v698_v32 = vpack.c.bf16 %v1330_v30, %v1327_v29 }
 0x107   :  { %v1332_v33 = vpop.f32.mrf.mxu0  ;;  %v1404_v24 = vpop.f32.mrf.mxu1 }
 0x108   :  { %1461 = vmatprep.mubr.bf16.mxu1 %v698_v32  ;;  %v1333_v36 = vadd.f32 %v1332_v33, %v1331_v31 }
 0x109   :  { %v1334_v34 = vpop.f32.mrf.mxu0  ;;  %v1406_v27 = vpop.f32.mrf.mxu1 }
 0x10b   :  { %v1335_v35 = vpop.f32.mrf.mxu0  ;;  %v1407_v33 = vpop.f32.mrf.mxu1 }
 0x10c   :  { %v1336_v37 = vadd.f32 %v1335_v35, %v1334_v34 }
 0x10d   :  { %v1337_v38 = vpop.f32.mrf.mxu0 }
 0x10e   :  { %v699_v39 = vpack.c.bf16 %v1336_v37, %v1333_v36  ;;  %v1409_v36 = vpop.f32.mrf.mxu1 }
 0x10f   :  { %v1338_v40 = vpop.f32.mrf.mxu0 }
 0x110   :  { %1462 = vmatmul.mubr.bf16.vlgmr.msra.gmra.mxu1 %v699_v39  ;;  %v1339_v43 = vadd.f32 %v1338_v40, %v1337_v38 }
 0x111   :  { %v1340_v41 = vpop.f32.mrf.mxu0 }
 0x113   :  { %v1341_v42 = vpop.f32.mrf.mxu0 }
 0x114   :  { %v1342_v44 = vadd.f32 %v1341_v42, %v1340_v41  ;;  %v1410_v42 = vpop.f32.mrf.mxu1 }
 0x115   :  { %v1343_v45 = vpop.f32.mrf.mxu0 }
 0x116   :  { %v700_v46 = vpack.c.bf16 %v1342_v44, %v1339_v43 }
 0x117   :  { %v1344_v47 = vpop.f32.mrf.mxu0 }
 0x118   :  { %1465 = vmatprep.mubr.bf16.mxu1 %v700_v46  ;;  %v1345_v50 = vadd.f32 %v1344_v47, %v1343_v45  ;;  %v1412_v45 = vpop.f32.mrf.mxu1 }
 0x119   :  { %v1346_v48 = vpop.f32.mrf.mxu0 }
 0x11b   :  { %v1347_v49 = vpop.f32.mrf.mxu0 }
 0x11c   :  { %v1348_v51 = vadd.f32 %v1347_v49, %v1346_v48 }
 0x11d   :  { %v1349_v52 = vpop.f32.mrf.mxu0 }
 0x11e   :  { %v701_v53 = vpack.c.bf16 %v1348_v51, %v1345_v50  ;;  %v1413_v51 = vpop.f32.mrf.mxu1 }
 0x11f   :  { %v1350_v54 = vpop.f32.mrf.mxu0 }
 0x120   :  { %1466 = vmatmul.mubr.bf16.gmra.mxu1 %v701_v53  ;;  %v1351_v57 = vadd.f32 %v1350_v54, %v1349_v52  ;;  %v1399_v53 = vadd.f32 %v1398_v6, %v1397_v0  ;;  %v1402_v54 = vadd.f32 %v1401_v15, %v1400_v9  ;;  %v984_v9 = vpop.permute.xlu1 %983 }
 0x121   :  { %v1352_v55 = vpop.f32.mrf.mxu0 }
 0x123   :  { %v1353_v56 = vpop.f32.mrf.mxu0 }
 0x124   :  { %v1354_v58 = vadd.f32 %v1353_v56, %v1352_v55  ;;  %v1415_v56 = vpop.f32.mrf.mxu1  ;;  %v989_v15 = vpop.permute.xlu1 %988 }
 0x125   :  { %v1355_v59 = vpop.f32.mrf.mxu0 }
 0x126   :  { %v702_v60 = vpack.c.bf16 %v1354_v58, %v1351_v57 }
 0x127   :  { %v1356_v61 = vpop.f32.mrf.mxu0 }
 0x128   :  { %1469 = vmatprep.mubr.bf16.mxu1 %v702_v60  ;;  %v1357_v1 = vadd.f32 %v1356_v61, %v1355_v59  ;;  %v710_v60 = vpack.c.bf16 %v1402_v54, %v1399_v53  ;;  %v1416_v61 = vpop.f32.mrf.mxu1 }
 0x129   :  { %v1358_v62 = vpop.f32.mrf.mxu0  ;;  %v1417_v0 = vadd.f32 %v1416_v61, %v1415_v56 }
 0x12b   :  { %v1359_v63 = vpop.f32.mrf.mxu0 }
 0x12c   :  { %v1360_v2 = vadd.f32 %v1359_v63, %v1358_v62  ;;  %v1405_v62 = vadd.f32 %v1404_v24, %v1403_v18  ;;  %v1408_v63 = vadd.f32 %v1407_v33, %v1406_v27  ;;  %v999_v27 = vpop.permute.xlu1 %998 }
 0x12d   :  { %v1361_v3 = vpop.f32.mrf.mxu0 }
 0x12e   :  { %v703_v4 = vpack.c.bf16 %v1360_v2, %v1357_v1  ;;  %v1411_v1 = vadd.f32 %v1410_v42, %v1409_v36  ;;  %v1414_v2 = vadd.f32 %v1413_v51, %v1412_v45 }
 0x12f   :  { %v1362_v5 = vpop.f32.mrf.mxu0 }
 0x130   :  { %1470 = vmatmul.mubr.bf16.gmra.mxu1 %v703_v4  ;;  %v1363_v10 = vadd.f32 %v1362_v5, %v1361_v3  ;;  %v1418_v3 = vpop.f32.mrf.mxu1  ;;  %v711_v4 = vpack.c.bf16 %v1408_v63, %v1405_v62  ;;  %v712_v5 = vpack.c.bf16 %v1414_v2, %v1411_v1 }
 0x131   :  { %v1364_v7 = vpop.f32.mrf.mxu0 }
 0x133   :  { %v1365_v8 = vpop.f32.mrf.mxu0 }
 0x134   :  { %v1366_v11 = vadd.f32 %v1365_v8, %v1364_v7  ;;  %v1419_v7 = vpop.f32.mrf.mxu1 }
 0x135   :  { %v1367_v12 = vpop.f32.mrf.mxu0  ;;  %v1420_v6 = vadd.f32 %v1419_v7, %v1418_v3 }
 0x136   :  { %v704_v13 = vpack.c.bf16 %v1366_v11, %v1363_v10  ;;  %v974_v10 = vpop.permute.xlu0 %973 }
 0x137   :  { %v1368_v14 = vpop.f32.mrf.mxu0  ;;  %v713_v8 = vpack.c.bf16 %v1420_v6, %v1417_v0 }
 0x138   :  { %1473 = vmatprep.mubr.bf16.mxu1 %v704_v13  ;;  %v1369_v19 = vadd.f32 %v1368_v14, %v1367_v12  ;;  %v1896_v12 = vld [vmem:[%s1937_s4] ss:$0 sm:$0xff]  ;;  %s1662_s4 = smov [#allocation8]  }
 0x139   :  { %v1370_v16 = vpop.f32.mrf.mxu0  ;;  %s1239_s21 = sshll.u32 %s1662_s4, 4  ;;  %s1240_s21 = int_to_ptr.vmem [resolvable:$true] %s1239_s21 }
 0x13a   :  { %v979_v18 = vpop.permute.xlu0 %978  ;;  %s1631_s22 = scalar_lea.vmem %s1240_s21, 4096  ;;  %p1636_p11 = scmp.lt.s32.totalorder %s1240_s21, %s1240_s21 }
 0x13b   :  { %v1371_v17 = vpop.f32.mrf.mxu0  ;;  %p1632_p10 = scmp.ne.s32.totalorder %s1240_s21, %s1631_s22  ;;  %p1637_p12 = scmp.lt.s32.totalorder %s1631_s22, %s1631_s22 }
 0x13c   :  { %v1372_v20 = vadd.f32 %v1371_v17, %v1370_v16 }
 0x13d   :  { %v1373_v21 = vpop.f32.mrf.mxu0  ;;  %p1638_p13 = por %p1637_p12, %p1636_p11 }
 0x13e   :  { %v705_v22 = vpack.c.bf16 %v1372_v20, %v1369_v19 }
 0x13f   :  { %v1374_v23 = vpop.f32.mrf.mxu0  ;;  %p1639_p0 = pnand %p1638_p13, %p1632_p10 }
 0x140   :  { %1474 = vmatmul.mubr.bf16.gmra.mxu1 %v705_v22  ;;  %v1375_v28 = vadd.f32 %v1374_v23, %v1373_v21 }
 0x141   :  { %v1376_v25 = vpop.f32.mrf.mxu0 }
 0x143   :  { %v1377_v26 = vpop.f32.mrf.mxu0 }
 0x144   :  { %v1378_v29 = vadd.f32 %v1377_v26, %v1376_v25  ;;  %v994_v26 = vpop.permute.xlu0 %993 }
 0x145   :  { %v1379_v30 = vpop.f32.mrf.mxu0 }
 0x146   :  { %v706_v31 = vpack.c.bf16 %v1378_v29, %v1375_v28 }
 0x147   :  { %v1380_v32 = vpop.f32.mrf.mxu0 }
 0x148   :  { %1477 = vmatprep.mubr.bf16.mxu1 %v706_v31  ;;  %v1381_v37 = vadd.f32 %v1380_v32, %v1379_v30  ;;  %v1004_v28 = vpop.permute.xlu0 %1003 }
 0x149   :  { %v1382_v34 = vpop.f32.mrf.mxu0 }
 0x14b   :  { %v1383_v35 = vpop.f32.mrf.mxu0 }
 0x14c   :  { %v1384_v38 = vadd.f32 %v1383_v35, %v1382_v34  ;;  %v1009_v34 = vpop.permute.xlu1 %1008  ;;  %v1014_v42 = vpop.permute.xlu0 %1013 }
 0x14d   :  { %v1385_v39 = vpop.f32.mrf.mxu0 }
 0x14e   :  { %v707_v40 = vpack.c.bf16 %v1384_v38, %v1381_v37 }
 0x14f   :  { %v1386_v41 = vpop.f32.mrf.mxu0 }
 0x150   :  { %1478 = vmatmul.mubr.bf16.gmra.mxu1 %v707_v40  ;;  %v1387_v46 = vadd.f32 %v1386_v41, %v1385_v39 }
 0x151   :  { %v1388_v43 = vpop.f32.mrf.mxu0 }
 0x153   :  { %v1389_v44 = vpop.f32.mrf.mxu0 }
 0x154   :  { %v1390_v47 = vadd.f32 %v1389_v44, %v1388_v43  ;;  %v1019_v43 = vpop.permute.xlu1 %1018  ;;  %v1024_v44 = vpop.permute.xlu0 %1023 }
 0x155   :  { %v1391_v48 = vpop.f32.mrf.mxu0 }
 0x156   :  { %v708_v49 = vpack.c.bf16 %v1390_v47, %v1387_v46 }
 0x157   :  { %v1392_v50 = vpop.f32.mrf.mxu0 }
 0x158   :  { %1481 = vmatprep.mubr.bf16.mxu1 %v708_v49  ;;  %v1393_v57 = vadd.f32 %v1392_v50, %v1391_v48  ;;  %v1029_v50 = vpop.permute.xlu1 %1028 }
 0x159   :  { %v1394_v52 = vpop.f32.mrf.mxu0 }
 0x15b   :  { %v1395_v55 = vpop.f32.mrf.mxu0 }
 0x15c   :  { %v1396_v58 = vadd.f32 %v1395_v55, %v1394_v52 }
 0x15e   :  { %v709_v59 = vpack.c.bf16 %v1396_v58, %v1393_v57  ;;  %v1034_v58 = vpop.permute.xlu0 %1033 }
 0x160   :  { %1482 = vmatmul.mubr.bf16.gmra.mxu1 %v709_v59  ;;  %v1039_v59 = vpop.permute.xlu1 %1038 }
 0x161   :  { %1485 = vmatprep.mubr.bf16.mxu1 %v710_v60 }
 0x162   :  { %v1044_v60 = vpop.permute.xlu0 %1043 }
 0x164   :  { %v1049_v3 = vpop.permute.xlu1 %1048 }
 0x166   :  { %v1054_v0 = vpop.permute.xlu0 %1053 }
 0x168   :  { %1486 = vmatmul.mubr.bf16.gmra.mxu1 %v711_v4 }
 0x169   :  { %1489 = vmatprep.mubr.bf16.mxu1 %v712_v5 }
 0x170   :  { %1490 = vmatmul.mubr.bf16.gmra.mxu1 %v713_v8 }
 0x1d0   :  { %v1463_v11 = vpop.f32.mrf.mxu1 }
 0x1d1   :  { %v1133_v13 = vmul.f32 %v1463_v11, %v984_v9  ;;  %v1059_v11 = vpop.permute.xlu1 %1058 }
 0x1d2   :  { %v812_v14 = vpop.f32.mrf.mxu1 }
 0x1d3   :  { %v1172_v16 = vadd.f32 %v1896_v12, %v1133_v13  ;;  %v1131_v17 = vmul.f32 %v974_v10, %v812_v14  ;;  %v1064_v13 = vpop.permute.xlu0 %1063 }
 0x1d4   :  { %v1464_v19 = vpop.f32.mrf.mxu1 }
 0x1d5   :  { %1204 = vst [vmem:[#allocation8 + $0x10] sm:$0xff] %v1172_v16  ;;  %v1170_v20 = vadd.f32 %v1896_v12, %v1131_v17  ;;  %v1134_v21 = vmul.f32 %v1464_v19, %v989_v15  ;;  %v1069_v14 = vpop.permute.xlu1 %1068 }
 0x1d6   :  { %v815_v22 = vpop.f32.mrf.mxu1 }
 0x1d7   :  { %1202 = vst [vmem:[#allocation8] sm:$0xff] %v1170_v20  ;;  %v1173_v23 = vadd.f32 %v1896_v12, %v1134_v21  ;;  %v1132_v24 = vmul.f32 %v979_v18, %v815_v22  ;;  %v1074_v17 = vpop.permute.xlu0 %1073 }
 0x1d9   :  { %1205 = vst [vmem:[#allocation8 + $0x18] sm:$0xff] %v1173_v23  ;;  %v1171_v25 = vadd.f32 %v1896_v12, %v1132_v24  ;;  %v1079_v24 = vpop.permute.xlu1 %1078 }
 0x1db   :  { %1203 = vst [vmem:[#allocation8 + $0x8] sm:$0xff] %v1171_v25 }
 0x1e0   :  { %v1467_v29 = vpop.f32.mrf.mxu1 }
 0x1e1   :  { %v1137_v30 = vmul.f32 %v1467_v29, %v1004_v28  ;;  %v1084_v28 = vpop.permute.xlu0 %1083 }
 0x1e2   :  { %v828_v31 = vpop.f32.mrf.mxu1 }
 0x1e3   :  { %v1176_v32 = vadd.f32 %v1896_v12, %v1137_v30  ;;  %v1135_v33 = vmul.f32 %v994_v26, %v828_v31  ;;  %v1089_v30 = vpop.permute.xlu1 %1088 }
 0x1e4   :  { %v1468_v35 = vpop.f32.mrf.mxu1 }
 0x1e5   :  { %1208 = vst [vmem:[#allocation8 + $0x30] sm:$0xff] %v1176_v32  ;;  %v1174_v36 = vadd.f32 %v1896_v12, %v1135_v33  ;;  %v1138_v37 = vmul.f32 %v1468_v35, %v1009_v34  ;;  %v1094_v31 = vpop.permute.xlu0 %1093 }
 0x1e6   :  { %v831_v38 = vpop.f32.mrf.mxu1 }
 0x1e7   :  { %1206 = vst [vmem:[#allocation8 + $0x20] sm:$0xff] %v1174_v36  ;;  %v1177_v39 = vadd.f32 %v1896_v12, %v1138_v37  ;;  %v1136_v40 = vmul.f32 %v999_v27, %v831_v38  ;;  %v1099_v34 = vpop.permute.xlu1 %1098 }
 0x1e9   :  { %1209 = vst [vmem:[#allocation8 + $0x38] sm:$0xff] %v1177_v39  ;;  %v1175_v41 = vadd.f32 %v1896_v12, %v1136_v40  ;;  %v1104_v38 = vpop.permute.xlu0 %1103 }
 0x1eb   :  { %1207 = vst [vmem:[#allocation8 + $0x28] sm:$0xff] %v1175_v41 }
 0x1f0   :  { %v1471_v45 = vpop.f32.mrf.mxu1 }
 0x1f1   :  { %v1141_v46 = vmul.f32 %v1471_v45, %v1024_v44  ;;  %v1109_v45 = vpop.permute.xlu1 %1108 }
 0x1f2   :  { %v844_v47 = vpop.f32.mrf.mxu1 }
 0x1f3   :  { %v1180_v48 = vadd.f32 %v1896_v12, %v1141_v46  ;;  %v1139_v49 = vmul.f32 %v1014_v42, %v844_v47 }
 0x1f4   :  { %v1472_v51 = vpop.f32.mrf.mxu1 }
 0x1f5   :  { %1212 = vst [vmem:[#allocation8 + $0x50] sm:$0xff] %v1180_v48  ;;  %v1178_v52 = vadd.f32 %v1896_v12, %v1139_v49  ;;  %v1142_v53 = vmul.f32 %v1472_v51, %v1029_v50  ;;  %v1114_v49 = vpop.permute.xlu0 %1113 }
 0x1f6   :  { %v847_v54 = vpop.f32.mrf.mxu1 }
 0x1f7   :  { %1210 = vst [vmem:[#allocation8 + $0x40] sm:$0xff] %v1178_v52  ;;  %v1181_v55 = vadd.f32 %v1896_v12, %v1142_v53  ;;  %v1140_v56 = vmul.f32 %v1019_v43, %v847_v54 }
 0x1f9   :  { %1213 = vst [vmem:[#allocation8 + $0x58] sm:$0xff] %v1181_v55  ;;  %v1179_v57 = vadd.f32 %v1896_v12, %v1140_v56  ;;  %v1119_v56 = vpop.permute.xlu1 %1118 }
 0x1fb   :  { %1211 = vst [vmem:[#allocation8 + $0x48] sm:$0xff] %v1179_v57 }
 0x200   :  { %v1475_v61 = vpop.f32.mrf.mxu1 }
 0x201   :  { %v1145_v62 = vmul.f32 %v1475_v61, %v1044_v60  ;;  %v1124_v60 = vpop.permute.xlu0 %1123 }
 0x202   :  { %v860_v63 = vpop.f32.mrf.mxu1 }
 0x203   :  { %v1184_v1 = vadd.f32 %v1896_v12, %v1145_v62  ;;  %v1143_v2 = vmul.f32 %v1034_v58, %v860_v63 }
 0x204   :  { %v1476_v4 = vpop.f32.mrf.mxu1 }
 0x205   :  { %1216 = vst [vmem:[#allocation8 + $0x70] sm:$0xff] %v1184_v1  ;;  %v1182_v5 = vadd.f32 %v1896_v12, %v1143_v2  ;;  %v1146_v7 = vmul.f32 %v1476_v4, %v1049_v3  ;;  %v1129_v4 = vpop.permute.xlu1 %1128 }
 0x206   :  { %v863_v6 = vpop.f32.mrf.mxu1 }
 0x207   :  { %1214 = vst [vmem:[#allocation8 + $0x60] sm:$0xff] %v1182_v5  ;;  %v1185_v8 = vadd.f32 %v1896_v12, %v1146_v7  ;;  %v1144_v9 = vmul.f32 %v1039_v59, %v863_v6 }
 0x209   :  { %1217 = vst [vmem:[#allocation8 + $0x78] sm:$0xff] %v1185_v8  ;;  %v1183_v10 = vadd.f32 %v1896_v12, %v1144_v9 }
 0x20b   :  { %1215 = vst [vmem:[#allocation8 + $0x68] sm:$0xff] %v1183_v10 }
 0x210   :  { %v1479_v15 = vpop.f32.mrf.mxu1 }
 0x211   :  { %v1149_v16 = vmul.f32 %v1479_v15, %v1064_v13 }
 0x212   :  { %v876_v18 = vpop.f32.mrf.mxu1 }
 0x213   :  { %v1188_v19 = vadd.f32 %v1896_v12, %v1149_v16  ;;  %v1147_v20 = vmul.f32 %v1054_v0, %v876_v18 }
 0x214   :  { %v1480_v21 = vpop.f32.mrf.mxu1 }
 0x215   :  { %1220 = vst [vmem:[#allocation8 + $0x90] sm:$0xff] %v1188_v19  ;;  %v1186_v22 = vadd.f32 %v1896_v12, %v1147_v20  ;;  %v1150_v23 = vmul.f32 %v1480_v21, %v1069_v14 }
 0x216   :  { %v879_v25 = vpop.f32.mrf.mxu1 }
 0x217   :  { %1218 = vst [vmem:[#allocation8 + $0x80] sm:$0xff] %v1186_v22  ;;  %v1189_v26 = vadd.f32 %v1896_v12, %v1150_v23  ;;  %v1148_v27 = vmul.f32 %v1059_v11, %v879_v25 }
 0x219   :  { %1221 = vst [vmem:[#allocation8 + $0x98] sm:$0xff] %v1189_v26  ;;  %v1187_v29 = vadd.f32 %v1896_v12, %v1148_v27 }
 0x21b   :  { %1219 = vst [vmem:[#allocation8 + $0x88] sm:$0xff] %v1187_v29 }
 0x220   :  { %v1483_v32 = vpop.f32.mrf.mxu1 }
 0x221   :  { %v1153_v33 = vmul.f32 %v1483_v32, %v1084_v28 }
 0x222   :  { %v892_v35 = vpop.f32.mrf.mxu1 }
 0x223   :  { %v1192_v36 = vadd.f32 %v1896_v12, %v1153_v33  ;;  %v1151_v37 = vmul.f32 %v1074_v17, %v892_v35 }
 0x224   :  { %v1484_v39 = vpop.f32.mrf.mxu1 }
 0x225   :  { %1224 = vst [vmem:[#allocation8 + $0xb0] sm:$0xff] %v1192_v36  ;;  %v1190_v40 = vadd.f32 %v1896_v12, %v1151_v37  ;;  %v1154_v41 = vmul.f32 %v1484_v39, %v1089_v30 }
 0x226   :  { %v895_v42 = vpop.f32.mrf.mxu1 }
 0x227   :  { %1222 = vst [vmem:[#allocation8 + $0xa0] sm:$0xff] %v1190_v40  ;;  %v1193_v43 = vadd.f32 %v1896_v12, %v1154_v41  ;;  %v1152_v44 = vmul.f32 %v1079_v24, %v895_v42 }
 0x228   :  { %v1487_v46 = vpop.f32.mrf.mxu1 }
 0x229   :  { %1225 = vst [vmem:[#allocation8 + $0xb8] sm:$0xff] %v1193_v43  ;;  %v1191_v47 = vadd.f32 %v1896_v12, %v1152_v44  ;;  %v1157_v48 = vmul.f32 %v1487_v46, %v1104_v38 }
 0x22a   :  { %v908_v50 = vpop.f32.mrf.mxu1 }
 0x22b   :  { %1223 = vst [vmem:[#allocation8 + $0xa8] sm:$0xff] %v1191_v47  ;;  %v1196_v51 = vadd.f32 %v1896_v12, %v1157_v48  ;;  %v1155_v52 = vmul.f32 %v1094_v31, %v908_v50 }
 0x22c   :  { %v1488_v53 = vpop.f32.mrf.mxu1 }
 0x22d   :  { %1228 = vst [vmem:[#allocation8 + $0xd0] sm:$0xff] %v1196_v51  ;;  %v1194_v54 = vadd.f32 %v1896_v12, %v1155_v52  ;;  %v1158_v55 = vmul.f32 %v1488_v53, %v1109_v45 }
 0x22e   :  { %v911_v57 = vpop.f32.mrf.mxu1 }
 0x22f   :  { %1226 = vst [vmem:[#allocation8 + $0xc0] sm:$0xff] %v1194_v54  ;;  %v1197_v58 = vadd.f32 %v1896_v12, %v1158_v55  ;;  %v1156_v59 = vmul.f32 %v1099_v34, %v911_v57 }
 0x230   :  { %v1491_v61 = vpop.f32.mrf.mxu1 }
 0x231   :  { %1229 = vst [vmem:[#allocation8 + $0xd8] sm:$0xff] %v1197_v58  ;;  %v1195_v62 = vadd.f32 %v1896_v12, %v1156_v59  ;;  %v1161_v63 = vmul.f32 %v1491_v61, %v1124_v60 }
 0x232   :  { %v924_v1 = vpop.f32.mrf.mxu1 }
 0x233   :  { %1227 = vst [vmem:[#allocation8 + $0xc8] sm:$0xff] %v1195_v62  ;;  %v1200_v2 = vadd.f32 %v1896_v12, %v1161_v63  ;;  %v1159_v3 = vmul.f32 %v1114_v49, %v924_v1 }
 0x234   :  { %v1492_v5 = vpop.f32.mrf.mxu1 }
 0x235   :  { %1232 = vst [vmem:[#allocation8 + $0xf0] sm:$0xff] %v1200_v2  ;;  %v1198_v7 = vadd.f32 %v1896_v12, %v1159_v3  ;;  %v1162_v0 = vmul.f32 %v1492_v5, %v1129_v4 }
 0x236   :  { %v927_v6 = vpop.f32.mrf.mxu1 }
 0x237   :  { %1230 = vst [vmem:[#allocation8 + $0xe0] sm:$0xff] %v1198_v7  ;;  %v1201_v8 = vadd.f32 %v1896_v12, %v1162_v0  ;;  %v1160_v9 = vmul.f32 %v1119_v56, %v927_v6 }
 0x239   :  { %1233 = vst [vmem:[#allocation8 + $0xf8] sm:$0xff] %v1201_v8  ;;  %v1199_v10 = vadd.f32 %v1896_v12, %v1160_v9 }
 0x23b   :  { %1231 = vst [vmem:[#allocation8 + $0xe8] sm:$0xff] %v1199_v10 }
 0x23c   :  { %1642 = shalt.err (!%p1639_p0)
}
 0x23d   :  { %s1663_s23 = smov 128   ;;  %s1664_s24 = smov 8  }
 0x23e   :  { %1245 = dma.vmem_to_hbm [thread:$0]  %s1240_s21, 4096, %s1938_s5, [#allocation5], %s1663_s23, %s1663_s23, %s1664_s24  }
 0x23f   :  { %1655 = dma.done.wait [#allocation5], 4096  }
 0x240   :  { %1656 = vsyncadd [#allocation5], 4294963200 }
 0x241   :  { %1249 = vsyncpa [#allocation4], 1 }
 0x242   :  { %1250 = vsyncpa [#allocation7], 1 }
 0x243   :  { %1251 = vsyncpa [#allocation5], 1 }

</bundles_post_ra>
